<compile_context>
chip_gen: v6e
topology: v6e:2x2x1
jax: 0.10.0
libtpu: 0.0.40
codegen_flags: <defaults>
</compile_context>

<pallas_src>
import functools

import jax
import jax.numpy as jnp
from jax import lax
from jax.experimental import pallas as pl
from jax.experimental.pallas import tpu as pltpu


def _round_up(x, m):
    return ((x + m - 1) // m) * m


def _focal_loss_kernel(logits_ref, target_ref, *rest,
                       gamma, n_total, tile_n, has_weight):
    if has_weight:
        weight_ref, out_ref = rest
    else:
        (out_ref,) = rest

    x = logits_ref[...].astype(jnp.float32)            # [tile_n, C]
    t = target_ref[...]                                  # [tile_n, 1] int32
    c = x.shape[1]

    # --- log_softmax along the class (lane) axis, reusing exp(z) ---
    m = jnp.max(x, axis=1, keepdims=True)
    z = x - m
    e = jnp.exp(z)                                        # 1 exp per element
    s = jnp.sum(e, axis=1, keepdims=True)                 # [tile_n, 1]
    logpt = z - jnp.log(s)                                # [tile_n, C]
    pt = e * pl.reciprocal(s, approx=False)               # reuse exp(z)

    # --- focal modulation: (1 - pt)^gamma * logpt ---
    one_minus_pt = 1.0 - pt
    if float(gamma).is_integer() and gamma >= 0:
        mod_logpt = logpt
        for _ in range(int(gamma)):                        # VPU multiplies, no pow
            mod_logpt = mod_logpt * one_minus_pt
    else:
        # Clamp avoids exp(g*log(negative)) -> NaN when pt rounds above 1.
        mod_logpt = (jnp.maximum(one_minus_pt, 0.0) ** gamma) * logpt

    # --- select target class per row (one-hot) + mask padded rows ---
    col = lax.broadcasted_iota(jnp.int32, (tile_n, c), 1)  # [tile_n, C]
    sel = col == t                                          # [tile_n, C] bool
    if n_total % tile_n != 0:
        row_ids = (pl.program_id(0) * tile_n
                   + lax.broadcasted_iota(jnp.int32, (tile_n, 1), 0))
        sel = jnp.logical_and(sel, row_ids < n_total)

    picked = jnp.where(sel, mod_logpt, 0.0)                 # [tile_n, C]

    # Per-lane partial sums (sublane reduce only); lanes + tiles are summed
    # in the wrapper, keeping the grid axis fully parallel.
    if has_weight:
        w = weight_ref[...].astype(jnp.float32)             # [1, C]
        num_lane = -jnp.sum(picked * w, axis=0, keepdims=True)       # [1, C]
        den_lane = jnp.sum(jnp.where(sel, w, 0.0), axis=0, keepdims=True)
        out_ref[...] = jnp.concatenate([num_lane, den_lane], axis=0)[None]
    else:
        num_lane = -jnp.sum(picked, axis=0, keepdims=True)            # [1, C]
        out_ref[...] = num_lane[None]


def focal_loss(logits, target, weight=None, gamma=2.0, tile_n=512):
    """logits: [N, C] float; target: [N] int; weight: optional [C] float."""
    n, c = logits.shape
    has_weight = weight is not None

    tile_n = min(int(tile_n), _round_up(n, 8))
    tile_n = _round_up(tile_n, 8)
    grid_n = pl.cdiv(n, tile_n)
    rows = 2 if has_weight else 1

    target_2d = target.astype(jnp.int32).reshape(n, 1)

    kernel = functools.partial(
        _focal_loss_kernel,
        gamma=float(gamma), n_total=n, tile_n=tile_n, has_weight=has_weight)

    in_specs = [
        pl.BlockSpec((tile_n, c), lambda i: (i, 0)),
        pl.BlockSpec((tile_n, 1), lambda i: (i, 0)),
    ]
    args = [logits, target_2d]
    if has_weight:
        in_specs.append(pl.BlockSpec((1, c), lambda i: (0, 0)))
        args.append(weight.astype(jnp.float32).reshape(1, c))

    itemsize = jnp.dtype(logits.dtype).itemsize
    cost = pl.CostEstimate(
        flops=int(10 * n * c),
        transcendentals=int(n * c + 2 * n),
        bytes_accessed=int(n * c * itemsize + 4 * n
                           + (4 * c if has_weight else 0)
                           + 4 * grid_n * rows * c),
    )

    partials = pl.pallas_call(
        kernel,
        out_shape=jax.ShapeDtypeStruct((grid_n, rows, c), jnp.float32),
        grid=(grid_n,),
        in_specs=in_specs,
        out_specs=pl.BlockSpec((1, rows, c), lambda i: (i, 0, 0)),
        compiler_params=pltpu.CompilerParams(
            dimension_semantics=("parallel",)),
        cost_estimate=cost,
    )(*args)

    num = jnp.sum(partials[:, 0, :])
    den = jnp.sum(partials[:, 1, :]) if has_weight else jnp.float32(n)
    return num / den


def _focal_loss_ref(logits, target, weight=None, gamma=2.0):
    """Pure-JAX reference mirroring the PyTorch module."""
    n, c = logits.shape
    if weight is None:
        weight = jnp.ones((c,), dtype=jnp.float32)
    logpt = jax.nn.log_softmax(logits.astype(jnp.float32), axis=1)
    pt = jnp.exp(logpt)
    logpt = ((1.0 - pt) ** gamma) * logpt
    picked = logpt[jnp.arange(n), target]
    w = weight[target]
    return -jnp.sum(w * picked) / jnp.sum(w)


if __name__ == "__main__":
    key = jax.random.PRNGKey(0)
    k1, k2, k3 = jax.random.split(key, 3)

    # Small shape consistent with the module: input [N, C], target [N].
    N, C = 8, 16
    logits = jax.random.normal(k1, (N, C), dtype=jnp.float32)
    target = jax.random.randint(k2, (N,), 0, C, dtype=jnp.int32)

    loss = jax.block_until_ready(focal_loss(logits, target, gamma=2.0))
    ref = _focal_loss_ref(logits, target, gamma=2.0)
    assert jnp.allclose(loss, ref, atol=1e-5, rtol=1e-5), (loss, ref)

    # Multi-tile + class-weighted path: exercises partial-tile masking and the
    # parallel grid axis with per-tile partial outputs.
    N2, C2 = 200, 32
    logits2 = jax.random.normal(k3, (N2, C2), dtype=jnp.float32)
    target2 = jax.random.randint(k2, (N2,), 0, C2, dtype=jnp.int32)
    weight2 = jnp.linspace(0.5, 1.5, C2, dtype=jnp.float32)
    loss2 = jax.block_until_ready(
        focal_loss(logits2, target2, weight=weight2, gamma=2.0, tile_n=64))
    ref2 = _focal_loss_ref(logits2, target2, weight=weight2, gamma=2.0)
    assert jnp.allclose(loss2, ref2, atol=1e-5, rtol=1e-5), (loss2, ref2)

    print("KERNEL_OK")
</pallas_src>

<mosaic_0001>
module attributes {stable_mosaic.version = 11 : i64} {
  func.func @_focal_loss_kernel(%arg0: i32, %arg1: memref<8x16xf32, #tpu.memory_space<vmem>>, %arg2: memref<8x1xi32, #tpu.memory_space<vmem>>, %arg3: memref<1x1x16xf32, #tpu.memory_space<vmem>>) attributes {dimension_semantics = [#tpu.dimension_semantics<parallel>], iteration_bounds = array<i64: 1>, scalar_prefetch = 0 : i64, scratch_operands = 0 : i64, tpu.core_type = #tpu.core_type<tc>, window_params = [{transform_indices = @transform_0, window_bounds = array<i64: 8, 16>}, {transform_indices = @transform_1, window_bounds = array<i64: 8, 1>}, {transform_indices = @transform_2, window_bounds = array<i64: 1, 1, 16>}]} {
    %c0 = arith.constant 0 : index
    %c0_0 = arith.constant 0 : index
    %0 = vector.load %arg1[%c0, %c0_0] : memref<8x16xf32, #tpu.memory_space<vmem>>, vector<8x16xf32>
    %c0_1 = arith.constant 0 : index
    %c0_2 = arith.constant 0 : index
    %1 = vector.load %arg2[%c0_1, %c0_2] : memref<8x1xi32, #tpu.memory_space<vmem>>, vector<8x1xi32>
    %cst = arith.constant dense<0xFF800000> : vector<8xf32>
    %2 = vector.multi_reduction <maximumf>, %0, %cst [1] : vector<8x16xf32> to vector<8xf32>
    %3 = vector.shape_cast %2 : vector<8xf32> to vector<8x1xf32>
    %4 = vector.broadcast %3 : vector<8x1xf32> to vector<8x16xf32>
    %5 = arith.subf %0, %4 : vector<8x16xf32>
    %6 = math.exp %5 : vector<8x16xf32>
    %cst_3 = arith.constant dense<0.000000e+00> : vector<8xf32>
    %7 = vector.multi_reduction <add>, %6, %cst_3 [1] : vector<8x16xf32> to vector<8xf32>
    %8 = vector.shape_cast %7 : vector<8xf32> to vector<8x1xf32>
    %9 = math.log %8 : vector<8x1xf32>
    %10 = vector.broadcast %9 : vector<8x1xf32> to vector<8x16xf32>
    %11 = arith.subf %5, %10 : vector<8x16xf32>
    %12 = tpu.reciprocal %8 : vector<8x1xf32> -> vector<8x1xf32>
    %13 = vector.broadcast %12 : vector<8x1xf32> to vector<8x16xf32>
    %14 = arith.mulf %6, %13 : vector<8x16xf32>
    %cst_4 = arith.constant 1.000000e+00 : f32
    %15 = vector.broadcast %cst_4 : f32 to vector<8x16xf32>
    %16 = arith.subf %15, %14 : vector<8x16xf32>
    %17 = arith.mulf %11, %16 : vector<8x16xf32>
    %18 = arith.mulf %17, %16 : vector<8x16xf32>
    %19 = tpu.iota {dimensions = array<i32: 1>} : vector<8x16xi32>
    %20 = vector.broadcast %1 : vector<8x1xi32> to vector<8x16xi32>
    %21 = arith.cmpi eq, %19, %20 : vector<8x16xi32>
    %cst_5 = arith.constant 0.000000e+00 : f32
    %22 = vector.broadcast %cst_5 : f32 to vector<8x16xf32>
    %23 = arith.select %21, %18, %22 : vector<8x16xi1>, vector<8x16xf32>
    %cst_6 = arith.constant dense<0.000000e+00> : vector<16xf32>
    %24 = vector.multi_reduction <add>, %23, %cst_6 [0] : vector<8x16xf32> to vector<16xf32>
    %25 = vector.shape_cast %24 : vector<16xf32> to vector<1x16xf32>
    %cst_7 = arith.constant 0.000000e+00 : f32
    %26 = vector.broadcast %cst_7 : f32 to vector<1x16xf32>
    %27 = arith.subf %26, %25 : vector<1x16xf32>
    %28 = vector.shape_cast %27 : vector<1x16xf32> to vector<1x1x16xf32>
    %c0_8 = arith.constant 0 : index
    %c0_9 = arith.constant 0 : index
    %c0_10 = arith.constant 0 : index
    %29 = vector.load %arg3[%c0_8, %c0_9, %c0_10] : memref<1x1x16xf32, #tpu.memory_space<vmem>>, vector<1x1x16xf32>
    tpu.vector_store %arg3[%c0_8, %c0_9, %c0_10], %28 {strides = array<i32>} : memref<1x1x16xf32, #tpu.memory_space<vmem>>, vector<1x1x16xf32>,
    return
  }
  func.func @transform_0(%arg0: i32) -> (i32, i32) {
    %c0_i32 = arith.constant 0 : i32
    %c0_i32_0 = arith.constant 0 : i32
    return %arg0, %c0_i32 : i32, i32
  }
  func.func @transform_1(%arg0: i32) -> (i32, i32) {
    %c0_i32 = arith.constant 0 : i32
    %c0_i32_0 = arith.constant 0 : i32
    return %arg0, %c0_i32 : i32, i32
  }
  func.func @transform_2(%arg0: i32) -> (i32, i32, i32) {
    %c0_i32 = arith.constant 0 : i32
    %c0_i32_0 = arith.constant 0 : i32
    %c0_i32_1 = arith.constant 0 : i32
    return %arg0, %c0_i32, %c0_i32_0 : i32, i32, i32
  }
}

</mosaic_0001>

<bundles_post_ra>
// kernel: tpu_custom_call.1
= control target key start
LH: loop header
LB: loop body
LE: loop exit
PB: predicated region body
PF: predicated region fallthrough
CT: control target
= control target key end

     0   :  { %vm14_vm0 = vcmask 130048   ;;  %s124_s0 = inlined_call_operand.vmem [shape: f32[8,16], index: 0, kind: input, shape index: {}]   ;;  %s125_s1 = inlined_call_operand.vmem [shape: s32[8,1], index: 1, kind: input, shape index: {}]   ;;  %s126_s2 = inlined_call_operand.hbm [shape: f32[1,1,16], index: 2, kind: output, shape index: {}]  }
   0x1   :  { %v12_v0 = vld [vmem:[%s124_s0] sm:$0xff] }
   0x2   :  { %7 = vsyncpa [#allocation3], 0  ;;  %v15_v1 = vsel %vm14_vm0, %v12_v0, -inf  ;;  %v13_v2 = vld [vmem:[%s125_s1] sm:$0xff]  ;;  %v95_v3 = vmov 0   ;;  %v32_v10 = vlaneseq  ;;  %s96_s0 = smov [#allocation2]  }
   0x3   :  { %16 = vmax.xlane.f32.xlu0 %v15_v1  ;;  %65 = vset.pattern.permute.xlu1 %v95_v3  ;;  %s55_s1 = sshll.u32 %s96_s0, 4  ;;  %vm47_vm2 = vcmask 122880   ;;  %s56_s1 = int_to_ptr.vmem [resolvable:$true] %s55_s1 }
   0x4   :  { %66 = vset.pattern.permute.xlu0 %v95_v3  ;;  %35 = vperm.xlu1 %65, %v13_v2   ;;  %v33_v16 = vand.u32 127, %v32_v10  ;;  %s73_s13 = scalar_lea.vmem %s56_s1, 16  ;;  %s77_s14 = scalar_lea.vmem %s56_s1, 32 }
   0x5   :  { %p74_p0 = scmp.ne.s32.totalorder %s56_s1, %s73_s13  ;;  %p78_p1 = scmp.lt.s32.totalorder %s56_s1, %s56_s1 }
   0x6   :  { %p79_p2 = scmp.lt.s32.totalorder %s77_s14, %s73_s13 }
   0x8   :  { %p80_p3 = por %p79_p2, %p78_p1 }
   0xa   :  { %p81_p4 = pnand %p80_p3, %p74_p0 }
  0x7f   :  { %v36_v17 = vpop.permute.xlu1 %35 }
  0x80   :  { %vm37_vm1 = vcmp.eq.s32.totalorder %v33_v16, %v36_v17 }
  0x8c   :  { %v17_v4 = vpop.xlane.xlu0 %16 }
  0x8d   :  { %v18_v5 = vsub.f32 %v12_v0, %v17_v4 }
  0x8f   :  { %v19_v6 = vmul.f32 1.442695, %v18_v5 }
  0x91   :  { %67 = vpow2.f32 %v19_v6 }
  0x9e   :  { %v68_v7 = vpop.eup %67 }
  0x9f   :  { %v21_v8 = vsel %vm14_vm0, %v68_v7, 0.0 }
  0xa0   :  { %22 = vadd.xlane.f32.xlu0 %v21_v8 }
 0x129   :  { %v23_v9 = vpop.xlane.xlu0 %22 }
 0x12a   :  { %69 = vlog2.f32 %v23_v9 }
 0x12b   :  { %71 = vrcp.f32 %v23_v9 }
 0x137   :  { %v70_v11 = vpop.eup %69 }
 0x138   :  { %v72_v12 = vpop.eup %71  ;;  %v25_v13 = vmul.f32 0.6931472, %v70_v11 }
 0x139   :  { %v28_v14 = vmul.f32 %v72_v12, %v68_v7 }
 0x13a   :  { %v26_v15 = vsub.f32 %v18_v5, %v25_v13 }
 0x13b   :  { %v29_v18 = vsub.f32 1.0, %v28_v14 }
 0x13d   :  { %v30_v19 = vmul.f32 %v29_v18, %v26_v15 }
 0x13f   :  { %v31_v20 = vmul.f32 %v30_v19, %v29_v18 }
 0x141   :  { %v38_v21 = vsel %vm37_vm1, %v31_v20, 0.0 }
 0x142   :  { %v39_v22 = vsel %vm14_vm0, %v38_v21, 0.0 }
 0x143   :  { %v40_v23 = vrot.slane %v39_v22, 4 }
 0x145   :  { %v41_v24 = vadd.f32 %v40_v23, %v39_v22 }
 0x147   :  { %v42_v25 = vrot.slane %v41_v24, 2 }
 0x149   :  { %v43_v26 = vadd.f32 %v42_v25, %v41_v24 }
 0x14b   :  { %v44_v27 = vrot.slane %v43_v26, 1 }
 0x14d   :  { %v45_v28 = vadd.f32 %v44_v27, %v43_v26 }
 0x14f   :  { %v46_v29 = vsub.f32 0.0, %v45_v28 }
 0x151   :  { %48 = vst.msk [vmem:[#allocation2] sm:$0x1] %vm47_vm2, %v46_v29 }
 0x152   :  { %84 = shalt.err (!%p81_p4)
}
 0x153   :  { %58 = dma.vmem_to_hbm [thread:$0]  %s56_s1, 16, %s126_s2, [#allocation3]  }
 0x154   :  { %93 = dma.done.wait [#allocation3], 16  }
 0x155   :  { %94 = vsyncadd [#allocation3], 4294967280 }
 0x156   :  { %62 = vsyncpa [#allocation3], 1 }

</bundles_post_ra>
